<compile_context>
chip_gen: v7x
topology: tpu7x:2x2x1
jax: 0.10.0
libtpu: 0.0.40
codegen_flags: <defaults>
</compile_context>

<pallas_src>
import jax
import jax.numpy as jnp
from jax import lax
from jax.experimental import pallas as pl
from jax.experimental.pallas import tpu as pltpu


def _round_up(a, m):
    return (a + m - 1) // m * m


def _conv_model_kernel(x_ref, w1_ref, w2_ref, b2_ref, wfc_ref, bfc_ref, o_ref):
    """One tile of TB batch elements per grid step.

    x_ref   : (TB, L*Cin+1) bf16  batch-major input tile, last column is ones
    w1_ref  : (L*d, L*Cin+1) bf16 conv1 banded matrix + bias column,
                                  rows ordered [even t | odd t]
    w2_ref  : (L2*d, L2*d) bf16   conv2 dense matrix over compacted pool1 output,
                                  rows ordered [even t2 | odd t2]
    b2_ref  : (L2*d, 1) f32
    wfc_ref : (L4*d, 1) f32       fc weight in compacted pool2 layout
    bfc_ref : (1, 1) f32
    o_ref   : (1, TB) f32         lane-dense output row
    """
    f32 = jnp.float32

    # ---- conv1 (k=5, pad=2) + bias (ones-column fold) + ReLU: one bf16 matmul.
    # Contract over the last dim of both operands so the result is feature-major
    # (L*d, TB) with the batch on the lanes.
    h1 = lax.dot_general(w1_ref[...], x_ref[...],
                         dimension_numbers=(((1,), (1,)), ((), ())),
                         preferred_element_type=f32)             # (320, TB)
    h1 = jnp.maximum(h1, 0.0)

    # ---- maxpool(2) #1: rows are ordered [even time | odd time], so pooling is
    # a single aligned elementwise max and the result is already compacted.
    half1 = h1.shape[0] // 2
    m1 = jnp.maximum(h1[:half1], h1[half1:])                     # (160, TB)

    # ---- conv2 (k=3, pad=1) + bias + ReLU: dense 160x160 bf16 matmul ----
    h2 = jnp.dot(w2_ref[...], m1.astype(w2_ref.dtype),
                 preferred_element_type=f32)                     # (160, TB)
    h2 = jnp.maximum(h2 + b2_ref[...], 0.0)

    # ---- maxpool(2) #2 (same even/odd row trick) ----
    half2 = h2.shape[0] // 2
    m2 = jnp.maximum(h2[:half2], h2[half2:])                     # (80, TB)

    # ---- dropout(p=0.2): eval-mode identity ----
    # TODO(synk): training-mode dropout RNG mask not reproduced (inference semantics).

    # ---- flatten + fc (output_size = 1): weighted sublane reduction ----
    y = jnp.sum(m2 * wfc_ref[...], axis=0, keepdims=True)        # (1, TB)
    o_ref[...] = y + bfc_ref[...]


def torch_conv_model_pallas(x, w1_pt, b1, w2_pt, b2, wfc_pt, bfc, *,
                            d_model=16, batch_tile=1024):
    """x: (B, L=20, Cin=3); weights in PyTorch layouts. Returns (B, output_size)."""
    B, L, Cin = x.shape
    assert L == 20 and Cin == 3, "module's fc layer fixes L=20, Cin=3"
    O = wfc_pt.shape[0]
    assert O == 1, "kernel specialised to output_size=1 (module default)"

    d = d_model
    L2, L4 = L // 2, L // 4
    f32, bf16 = jnp.float32, jnp.bfloat16

    # ---------------- one-time weight preprocessing (plain XLA, tiny) ----------
    # conv1 as a banded matrix over the flattened (t*Cin + i) input.  Output rows
    # are permuted to [even t | odd t] (within each half: row = (t//2)*d + o) so
    # the first maxpool is max(top half, bottom half).  A bias column is appended
    # so the kernel streams x with a trailing ones column and skips the bias add.
    W1 = jnp.zeros((L, d, L, Cin), f32)
    for k in range(5):
        t_out = jnp.arange(L)
        t_in = t_out + k - 2
        valid = (t_in >= 0) & (t_in < L)
        wk = w1_pt[:, :, k].astype(f32)                            # (o=d, i=Cin)
        W1 = W1.at[t_out, :, jnp.clip(t_in, 0, L - 1), :].add(
            jnp.where(valid[:, None, None], wk[None, :, :], 0.0))
    W1 = W1.reshape(L, d, L * Cin)
    W1 = jnp.concatenate([W1[0::2], W1[1::2]], axis=0).reshape(L * d, L * Cin)
    b1_col = jnp.tile(b1.astype(f32), L).reshape(L * d, 1)
    W1A = jnp.concatenate([W1, b1_col], axis=1).astype(bf16)       # (320, 61)

    # conv2 as a DENSE (L2*d, L2*d) matrix over the compacted pool1 output
    # (row layout t2*d + c), with its own output rows permuted [even t2 | odd t2].
    W2 = jnp.zeros((L2, d, L2, d), f32)
    for j in range(3):
        t2o = jnp.arange(L2)
        t2i = t2o + j - 1
        valid = (t2i >= 0) & (t2i < L2)
        wj = w2_pt[:, :, j].astype(f32)                            # (o=d, c=d)
        W2 = W2.at[t2o, :, jnp.clip(t2i, 0, L2 - 1), :].add(
            jnp.where(valid[:, None, None], wj[None, :, :], 0.0))
    W2 = W2.reshape(L2, d, L2 * d)
    W2P = jnp.concatenate([W2[0::2], W2[1::2]], axis=0).reshape(L2 * d, L2 * d)
    W2P = W2P.astype(bf16)                                         # (160, 160)
    b2_col = jnp.tile(b2.astype(f32), L2).reshape(L2 * d, 1)       # (160, 1)

    # fc weight re-ordered to the compacted pool2 layout (row = t4*d + c).
    # PyTorch flattens the NCL tensor channel-major: fc index = c*L4 + t4.
    wfc_col = jnp.transpose(wfc_pt.reshape(O, d, L4).astype(f32),
                            (2, 1, 0)).reshape(L4 * d, O)          # (80, 1)
    bfc_sc = bfc.astype(f32).reshape(1, O)                         # (1, 1)

    # ---------------- input: batch-major bf16 slab (no HBM transpose) ----------
    # Single fused wrapper pass: reshape (free) + ones column + bf16 cast.
    x2 = x.reshape(B, L * Cin)
    x_aug = jnp.concatenate(
        [x2, jnp.ones((B, 1), x2.dtype)], axis=1).astype(bf16)     # (B, 61)

    # Batch tile: big enough to amortise the ~0.35us/step overhead, and split so
    # there are >= 2 grid steps whenever possible (v7x has 2 TensorCores).
    TB = max(128, min(batch_tile, _round_up(B, 128)))
    TB = _round_up(TB, 128)
    if _round_up(B, TB) // TB < 2 and TB > 128:
        TB = _round_up(max(128, TB // 2), 128)
    Bp = _round_up(B, TB)
    if Bp != B:
        x_aug = jnp.pad(x_aug, ((0, Bp - B), (0, 0)))
    n_tiles = Bp // TB

    LC1 = L * Cin + 1
    out = pl.pallas_call(
        _conv_model_kernel,
        out_shape=jax.ShapeDtypeStruct((1, Bp), f32),
        grid_spec=pltpu.PrefetchScalarGridSpec(
            num_scalar_prefetch=0,
            grid=(n_tiles,),
            in_specs=[
                pl.BlockSpec((TB, LC1), lambda j: (j, 0)),         # x tile (streamed)
                pl.BlockSpec((L * d, LC1), lambda j: (0, 0)),      # conv1+b1 (resident)
                pl.BlockSpec((L2 * d, L2 * d), lambda j: (0, 0)),  # conv2 (resident)
                pl.BlockSpec((L2 * d, 1), lambda j: (0, 0)),       # b2
                pl.BlockSpec((L4 * d, O), lambda j: (0, 0)),       # fc (resident)
                pl.BlockSpec((1, O), lambda j: (0, 0)),            # bfc
            ],
            out_specs=pl.BlockSpec((1, TB), lambda j: (0, j)),     # lane-dense output
        ),
        compiler_params=pltpu.CompilerParams(
            dimension_semantics=("parallel",)),
    )(x_aug, W1A, W2P, b2_col, wfc_col, bfc_sc)

    return out[0, :B].reshape(B, O)


def torch_conv_model_ref(x, w1_pt, b1, w2_pt, b2, wfc_pt, bfc):
    """Pure-JAX f32 reference mirroring the PyTorch forward (NCL conv path)."""
    B, L, _ = x.shape
    xt = jnp.transpose(x, (0, 2, 1))                                    # (B, 3, L)
    h = lax.conv_general_dilated(xt, w1_pt, (1,), [(2, 2)],
                                 dimension_numbers=("NCH", "OIH", "NCH"))
    h = jax.nn.relu(h + b1[None, :, None])
    h = jnp.max(h.reshape(B, h.shape[1], L // 2, 2), axis=-1)           # maxpool(2)
    h2 = lax.conv_general_dilated(h, w2_pt, (1,), [(1, 1)],
                                  dimension_numbers=("NCH", "OIH", "NCH"))
    h2 = jax.nn.relu(h2 + b2[None, :, None])
    h2 = jnp.max(h2.reshape(B, h2.shape[1], L // 4, 2), axis=-1)        # maxpool(2)
    flat = h2.reshape(B, -1)                                            # channel-major flatten
    return flat @ wfc_pt.T + bfc[None, :]


if __name__ == "__main__":
    B, L, Cin, d_model, O = 200, 20, 3, 16, 1

    key = jax.random.PRNGKey(0)
    ks = jax.random.split(key, 7)

    def u(k, shape, fan_in):
        a = 1.0 / (fan_in ** 0.5)
        return jax.random.uniform(k, shape, jnp.float32, -a, a)

    # Deterministic parameter init (PyTorch layouts / fan-in style bounds).
    w1 = u(ks[0], (d_model, Cin, 5), Cin * 5)          # Conv1d(3, 16, 5)
    b1 = u(ks[1], (d_model,), Cin * 5)
    w2 = u(ks[2], (d_model, d_model, 3), d_model * 3)  # Conv1d(16, 16, 3)
    b2 = u(ks[3], (d_model,), d_model * 3)
    wfc = u(ks[4], (O, 5 * d_model), 5 * d_model)      # Linear(80, 1)
    bfc = u(ks[5], (O,), 5 * d_model)

    x = jax.random.normal(ks[6], (B, L, Cin), jnp.float32)

    y = torch_conv_model_pallas(x, w1, b1, w2, b2, wfc, bfc, d_model=d_model)
    jax.block_until_ready(y)

    y_ref = torch_conv_model_ref(x, w1, b1, w2, b2, wfc, bfc)
    assert y.shape == (B, O)
    # bf16 operands with f32 accumulation vs. the pure-f32 reference.
    assert jnp.allclose(y, y_ref, rtol=3e-2, atol=3e-2), (
        float(jnp.max(jnp.abs(y - y_ref))))

    print("KERNEL_OK")
</pallas_src>

<mosaic_0001>
module attributes {stable_mosaic.version = 11 : i64} {
  func.func @_conv_model_kernel(%arg0: i32, %arg1: memref<128x61xbf16, #tpu.memory_space<vmem>>, %arg2: memref<320x61xbf16, #tpu.memory_space<vmem>>, %arg3: memref<160x160xbf16, #tpu.memory_space<vmem>>, %arg4: memref<160x1xf32, #tpu.memory_space<vmem>>, %arg5: memref<80x1xf32, #tpu.memory_space<vmem>>, %arg6: memref<1x1xf32, #tpu.memory_space<vmem>>, %arg7: memref<1x128xf32, #tpu.memory_space<vmem>>) attributes {dimension_semantics = [#tpu.dimension_semantics<parallel>], iteration_bounds = array<i64: 2>, scalar_prefetch = 0 : i64, scratch_operands = 0 : i64, tpu.core_type = #tpu.core_type<tc>, window_params = [{transform_indices = @transform_0, window_bounds = array<i64: 128, 61>}, {pipeline_mode = #tpu.pipeline_mode<synchronous>, transform_indices = @transform_1, window_bounds = array<i64: 320, 61>}, {pipeline_mode = #tpu.pipeline_mode<synchronous>, transform_indices = @transform_2, window_bounds = array<i64: 160, 160>}, {pipeline_mode = #tpu.pipeline_mode<synchronous>, transform_indices = @transform_3, window_bounds = array<i64: 160, 1>}, {pipeline_mode = #tpu.pipeline_mode<synchronous>, transform_indices = @transform_4, window_bounds = array<i64: 80, 1>}, {pipeline_mode = #tpu.pipeline_mode<synchronous>, transform_indices = @transform_5, window_bounds = array<i64: 1, 1>}, {transform_indices = @transform_6, window_bounds = array<i64: 1, 128>}]} {
    %c0 = arith.constant 0 : index
    %c0_0 = arith.constant 0 : index
    %0 = vector.load %arg2[%c0, %c0_0] : memref<320x61xbf16, #tpu.memory_space<vmem>>, vector<320x61xbf16>
    %c0_1 = arith.constant 0 : index
    %c0_2 = arith.constant 0 : index
    %1 = vector.load %arg1[%c0_1, %c0_2] : memref<128x61xbf16, #tpu.memory_space<vmem>>, vector<128x61xbf16>
    %cst = arith.constant dense<0.000000e+00> : vector<320x128xf32>
    %2 = tpu.matmul %0, %1, %cst {dimension_numbers = #tpu.dot_dimension_numbers<[1], [1], [0], [0], [0, 0, 1, 0], [], []>} : vector<320x61xbf16>, vector<128x61xbf16>, vector<320x128xf32> -> vector<320x128xf32>
    %cst_3 = arith.constant 0.000000e+00 : f32
    %3 = vector.broadcast %cst_3 : f32 to vector<320x128xf32>
    %4 = arith.maximumf %2, %3 : vector<320x128xf32>
    %5 = vector.extract_strided_slice %4 {offsets = [0, 0], sizes = [160, 128], strides = [1, 1]} : vector<320x128xf32> to vector<160x128xf32>
    %6 = vector.extract_strided_slice %4 {offsets = [160, 0], sizes = [160, 128], strides = [1, 1]} : vector<320x128xf32> to vector<160x128xf32>
    %7 = arith.maximumf %5, %6 : vector<160x128xf32>
    %c0_4 = arith.constant 0 : index
    %c0_5 = arith.constant 0 : index
    %8 = vector.load %arg3[%c0_4, %c0_5] : memref<160x160xbf16, #tpu.memory_space<vmem>>, vector<160x160xbf16>
    %9 = arith.truncf %7 : vector<160x128xf32> to vector<160x128xbf16>
    %cst_6 = arith.constant dense<0.000000e+00> : vector<160x128xf32>
    %10 = tpu.matmul %8, %9, %cst_6 {dimension_numbers = #tpu.dot_dimension_numbers<[1], [0], [0], [1], [0, 0, 1, 1], [], []>} : vector<160x160xbf16>, vector<160x128xbf16>, vector<160x128xf32> -> vector<160x128xf32>
    %c0_7 = arith.constant 0 : index
    %c0_8 = arith.constant 0 : index
    %11 = vector.load %arg4[%c0_7, %c0_8] : memref<160x1xf32, #tpu.memory_space<vmem>>, vector<160x1xf32>
    %12 = vector.broadcast %11 : vector<160x1xf32> to vector<160x128xf32>
    %13 = arith.addf %10, %12 : vector<160x128xf32>
    %cst_9 = arith.constant 0.000000e+00 : f32
    %14 = vector.broadcast %cst_9 : f32 to vector<160x128xf32>
    %15 = arith.maximumf %13, %14 : vector<160x128xf32>
    %16 = vector.extract_strided_slice %15 {offsets = [0, 0], sizes = [80, 128], strides = [1, 1]} : vector<160x128xf32> to vector<80x128xf32>
    %17 = vector.extract_strided_slice %15 {offsets = [80, 0], sizes = [80, 128], strides = [1, 1]} : vector<160x128xf32> to vector<80x128xf32>
    %18 = arith.maximumf %16, %17 : vector<80x128xf32>
    %c0_10 = arith.constant 0 : index
    %c0_11 = arith.constant 0 : index
    %19 = vector.load %arg5[%c0_10, %c0_11] : memref<80x1xf32, #tpu.memory_space<vmem>>, vector<80x1xf32>
    %20 = vector.broadcast %19 : vector<80x1xf32> to vector<80x128xf32>
    %21 = arith.mulf %18, %20 : vector<80x128xf32>
    %cst_12 = arith.constant dense<0.000000e+00> : vector<128xf32>
    %22 = vector.multi_reduction <add>, %21, %cst_12 [0] : vector<80x128xf32> to vector<128xf32>
    %23 = vector.shape_cast %22 : vector<128xf32> to vector<1x128xf32>
    %c0_13 = arith.constant 0 : index
    %c0_14 = arith.constant 0 : index
    %24 = vector.load %arg6[%c0_13, %c0_14] : memref<1x1xf32, #tpu.memory_space<vmem>>, vector<1x1xf32>
    %25 = vector.broadcast %24 : vector<1x1xf32> to vector<1x128xf32>
    %26 = arith.addf %23, %25 : vector<1x128xf32>
    %c0_15 = arith.constant 0 : index
    %c0_16 = arith.constant 0 : index
    %27 = vector.load %arg7[%c0_15, %c0_16] : memref<1x128xf32, #tpu.memory_space<vmem>>, vector<1x128xf32>
    tpu.vector_store %arg7[%c0_15, %c0_16], %26 {strides = array<i32>} : memref<1x128xf32, #tpu.memory_space<vmem>>, vector<1x128xf32>,
    return
  }
  func.func @transform_0(%arg0: i32) -> (i32, i32) {
    %c0_i32 = arith.constant 0 : i32
    %c0_i32_0 = arith.constant 0 : i32
    return %arg0, %c0_i32 : i32, i32
  }
  func.func @transform_1(%arg0: i32) -> (i32, i32) {
    %c0_i32 = arith.constant 0 : i32
    %c0_i32_0 = arith.constant 0 : i32
    %c0_i32_1 = arith.constant 0 : i32
    return %c0_i32, %c0_i32_0 : i32, i32
  }
  func.func @transform_2(%arg0: i32) -> (i32, i32) {
    %c0_i32 = arith.constant 0 : i32
    %c0_i32_0 = arith.constant 0 : i32
    %c0_i32_1 = arith.constant 0 : i32
    return %c0_i32, %c0_i32_0 : i32, i32
  }
  func.func @transform_3(%arg0: i32) -> (i32, i32) {
    %c0_i32 = arith.constant 0 : i32
    %c0_i32_0 = arith.constant 0 : i32
    %c0_i32_1 = arith.constant 0 : i32
    return %c0_i32, %c0_i32_0 : i32, i32
  }
  func.func @transform_4(%arg0: i32) -> (i32, i32) {
    %c0_i32 = arith.constant 0 : i32
    %c0_i32_0 = arith.constant 0 : i32
    %c0_i32_1 = arith.constant 0 : i32
    return %c0_i32, %c0_i32_0 : i32, i32
  }
  func.func @transform_5(%arg0: i32) -> (i32, i32) {
    %c0_i32 = arith.constant 0 : i32
    %c0_i32_0 = arith.constant 0 : i32
    %c0_i32_1 = arith.constant 0 : i32
    return %c0_i32, %c0_i32_0 : i32, i32
  }
  func.func @transform_6(%arg0: i32) -> (i32, i32) {
    %c0_i32 = arith.constant 0 : i32
    %c0_i32_0 = arith.constant 0 : i32
    return %c0_i32, %arg0 : i32, i32
  }
}

</mosaic_0001>

<bundles_post_ra>
// kernel: tpu_custom_call.1
= control target key start
LH: loop header
LB: loop body
LE: loop exit
PB: predicated region body
PF: predicated region fallthrough
CT: control target
= control target key end

     0   :  { %s2195_s0 = inlined_call_operand.vmem [shape: bf16[256,61], index: 0, kind: input, shape index: {}]   ;;  %s2196_s1 = inlined_call_operand.vmem [shape: bf16[320,61], index: 1, kind: input, shape index: {}]   ;;  %s2197_s2 = inlined_call_operand.vmem [shape: bf16[160,160], index: 2, kind: input, shape index: {}]   ;;  %s2198_s3 = inlined_call_operand.vmem [shape: f32[160,1], index: 3, kind: input, shape index: {}]   ;;  %s2199_s4 = inlined_call_operand.vmem [shape: f32[80,1], index: 4, kind: input, shape index: {}]   ;;  %s2200_s5 = inlined_call_operand.<no memory space> [shape: f32[1,1], index: 5, kind: input, shape index: {}]   ;;  %s2201_s6 = inlined_call_operand.hbm [shape: f32[1,256], index: 6, kind: output, shape index: {}]  }
   0x1   :  { %v11_v0 = vstv %s2200_s5 }
   0x2   :  { %12 = vst [vmem:[#allocation2] sm:$0x1] %v11_v0 }
   0x3   :  { %13 = vsyncpa [#allocation4], 0 }
   0x4   :  { %15 = vsyncpa [#allocation4 + $0x1], 0  ;;  %s1750_s23 = smov 0   ;;  %s1752_s24 = smov 0  }
   0x5   :  { %s1754_s25 = smov 0   ;;  %s1756_s26 = smov 0  }
   0x6 LB: > { %s1366_s5 = sadd.s32 4294967295, %s1708_s26   ;;  %s1367_s27 = sadd.s32 4294967294, %s1708_s26   ;;  %s1708_s26 = sphi %s1756_s26, %s2207_s26   ;;  %s1704_s25 = sphi %s1754_s25, %s2206_s25   ;;  %s1700_s24 = sphi %s1752_s24, %s2205_s24   ;;  %s1696_s23 = sphi %s1750_s23, %s2204_s23  }
   0x7   : > { %s1773_s28 = sadd.s32 1, %s1708_s26   ;;  %s159_s29 = sadd.s32 1, %s1704_s25 }
   0x8   : > { %s156_s30 = ssub.s32 %s1708_s26, %s1773_s28  ;;  %p169_p0 = scmp.ne.s32.totalorder %s1704_s25, %s1700_s24 }
   0x9   : > { %p157_p1 = scmp.eq.s32.totalorder %s156_s30, 0  ;;  %p170_p2 = scmp.eq.s32.totalorder %s1366_s5, 1 }
   0xa   : > { %p175_p3 = scmp.ne.s32.totalorder %s1700_s24, %s1696_s23  ;;  %p176_p4 = scmp.eq.s32.totalorder %s1367_s27, 1 }
   0xb   : > { %s1783_s7 = scalar_select %p157_p1, %s1704_s25, %s159_s29  }
   0xc   : > { %p1785_p5 = por %p170_p2, %p169_p0  ;;  %p1789_p6 = por %p176_p4, %p175_p3 }
   0xd   : > { %p1370_p7 = scmp.ge.s32.totalorder %s1708_s26, 1  ;;  %p218_p8 = scmp.lt.s32.totalorder %s1708_s26, 3 }
   0xf   : > { %p219_p9 = pnand %p1370_p7, %p218_p8 }
  0x10   : > { %s1795_s10 = sshll.u32 (!%p219_p9), %s1366_s5, 4  ;;  %v1596_v1 = vld [vmem:[%s2196_s1] sm:$0xff] (!%p219_p9)   ;;  %vm450_vm0 = vcmask (!%p219_p9), 498688   ;;  %v1597_v18 = vld [vmem:[%s2196_s1 + $0x8] sm:$0xff] (!%p219_p9)   ;;  %v1598_v19 = vld [vmem:[%s2196_s1 + $0x10] sm:$0xff] (!%p219_p9)   ;;  %v1710_v37 = vmov (!%p219_p9), 0  }
  0x11   : > { %222 = sbr.rel (%p219_p9) target bundleno = 717 (0x2cd), region = 44  ;;  %p248_p10 = scmp.lt.s32.totalorder (!%p219_p9), %s1795_s10, 31  ;;  %1498 = vmatprep.mubr.msk.bf16.mxu0 (!%p219_p9), %vm450_vm0, %v1596_v1  ;;  %v1599_v20 = vld [vmem:[%s2196_s1 + $0x18] sm:$0xff] (!%p219_p9)   ;;  %v1600_v21 = vld [vmem:[%s2196_s1 + $0x20] sm:$0xff] (!%p219_p9)   ;;  %v1601_v22 = vld [vmem:[%s2196_s1 + $0x28] sm:$0xff] (!%p219_p9)   ;;  %1059 = vmatprep.subr.bf16.mxu1 (!%p219_p9), %v1710_v37  ;;  %vm1028_vm1 = vcmask (!%p219_p9), 261120  }
  0x12   : > { %v1602_v23 = vld [vmem:[%s2196_s1 + $0x30] sm:$0xff] (!%p219_p9)   ;;  %v1603_v24 = vld [vmem:[%s2196_s1 + $0x38] sm:$0xff] (!%p219_p9)   ;;  %v1604_v25 = vld [vmem:[%s2196_s1 + $0x40] sm:$0xff] (!%p219_p9)   ;;  %1586 = vset.pattern.permute.xlu0 (!%p219_p9), %v1710_v37  ;;  %1587 = vset.pattern.permute.xlu1 (!%p219_p9), %v1710_v37  ;;  %s245_s12 = sand.u32 (!%p219_p9), 1, %s1700_s24   ;;  %s1711_s20 = smov (!%p219_p9), [#allocation3]  }
  0x13   : > { %v1605_v26 = vld [vmem:[%s2196_s1 + $0x48] sm:$0xff] (!%p219_p9)   ;;  %v1606_v27 = vld [vmem:[%s2196_s1 + $0x50] sm:$0xff] (!%p219_p9)   ;;  %v1607_v28 = vld [vmem:[%s2196_s1 + $0x58] sm:$0xff] (!%p219_p9)   ;;  %s1300_s18 = scalar_lea.sflag (!%p219_p9), [#allocation4], %s245_s12  ;;  %s1650_s21 = sshll.u32 (!%p219_p9), %s1711_s20, 4  ;;  %s1651_s21 = int_to_ptr.vmem [resolvable:$false] %s1650_s21 }
  0x14   : > { %v1608_v29 = vld [vmem:[%s2196_s1 + $0x60] sm:$0xff] (!%p219_p9)   ;;  %v1609_v30 = vld [vmem:[%s2196_s1 + $0x68] sm:$0xff] (!%p219_p9)   ;;  %v1610_v31 = vld [vmem:[%s2196_s1 + $0x70] sm:$0xff] (!%p219_p9)   ;;  %s1652_s22 = scalar_lea.vmem (!%p219_p9), %s1651_s21, 32 }
  0x15   : > { %v1611_v32 = vld [vmem:[%s2196_s1 + $0x78] sm:$0xff] (!%p219_p9)   ;;  %v1612_v33 = vld [vmem:[%s2196_s1 + $0x80] sm:$0xff] (!%p219_p9)   ;;  %v1613_v34 = vld [vmem:[%s2196_s1 + $0x88] sm:$0xff] (!%p219_p9)  }
  0x16   : > { %v1614_v35 = vld [vmem:[%s2196_s1 + $0x90] sm:$0xff] (!%p219_p9)   ;;  %v1615_v36 = vld [vmem:[%s2196_s1 + $0x98] sm:$0xff] (!%p219_p9)   ;;  %v1618_v38 = vld [vmem:[%s2197_s2 + $0x4] ss:$8 sps:$4 sm:$0xff] (!%p219_p9)  }
  0x17   : > { %1441 = vmatprep.mubr.msk.bf16.mxu1 (!%p219_p9), %vm1028_vm1, %v1618_v38  ;;  %v818_v41 = vld [vmem:[%s2198_s3] sm:$0xff] (!%p219_p9)  ;;  %v819_v46 = vld [vmem:[%s2198_s3 + $0x8] sm:$0xff] (!%p219_p9)  ;;  %v820_v47 = vld [vmem:[%s2198_s3 + $0x10] sm:$0xff] (!%p219_p9) }
  0x18   : > { %s249_s13 = scalar_select %p248_p10, %s1795_s10, 31  ;;  %840 = vperm.xlu0 %1586, %v818_v41   ;;  %850 = vperm.xlu1 %1587, %v820_v47   ;;  %v822_v50 = vld [vmem:[%s2198_s3 + $0x20] sm:$0xff]  ;;  %v821_v51 = vld [vmem:[%s2198_s3 + $0x18] sm:$0xff]  ;;  %v828_v55 = vld [vmem:[%s2198_s3 + $0x50] sm:$0xff] }
  0x19   : > { %v829_v54 = vld [vmem:[%s2198_s3 + $0x58] sm:$0xff]  ;;  %v831_v58 = vld [vmem:[%s2198_s3 + $0x68] sm:$0xff]  ;;  %v830_v59 = vld [vmem:[%s2198_s3 + $0x60] sm:$0xff] }
  0x1a   : > { %s1372_s14 = sshll.u32 %s249_s13, 2  ;;  %v1202_v62 = vld [vmem:[%s2199_s4] sm:$0xff]  ;;  %v832_v63 = vld [vmem:[%s2198_s3 + $0x70] sm:$0xff]  ;;  %s246_s13 = scalar_lea.vmem [#allocation3], %s245_s12 }
  0x1b   : > { %s251_s17 = scalar_lea.vmem %s2195_s0, %s1372_s14  ;;  %s1312_s14 = sshll.u32 %s246_s13, 4  ;;  %s2155_s14 = int_to_ptr.vmem [resolvable:$true] %s1312_s14 }
  0x1c   : > { %v1588_v2 = vld [vmem:[%s251_s17] sm:$0xff]   ;;  %v1589_v3 = vld [vmem:[%s251_s17 + $0x8] sm:$0xff]   ;;  %v1590_v6 = vld [vmem:[%s251_s17 + $0x10] sm:$0xff]   ;;  %845 = vperm.xlu0 %1586, %v819_v46   ;;  %855 = vperm.xlu1 %1587, %v821_v51   ;;  %s1646_s19 = scalar_lea.vmem %s2155_s14, 16  ;;  %p1653_p0 = scmp.lt.s32.totalorder %s2155_s14, %s1651_s21 }
  0x1d   : > { %1538 = vmatprep.subr.msk.bf16.mxu0 %vm450_vm0, %v1588_v2  ;;  %v512_v4 = vsel %vm450_vm0, %v1588_v2, 0  ;;  %v515_v5 = vsel %vm450_vm0, %v1589_v3, 0  ;;  %v518_v7 = vsel %vm450_vm0, %v1590_v6, 0  ;;  %v1591_v8 = vld [vmem:[%s251_s17 + $0x18] sm:$0xff]   ;;  %v1592_v9 = vld [vmem:[%s251_s17 + $0x20] sm:$0xff]   ;;  %v1593_v12 = vld [vmem:[%s251_s17 + $0x28] sm:$0xff]   ;;  %p1647_p11 = scmp.ne.s32.totalorder %s2155_s14, %s1646_s19  ;;  %p1654_p1 = scmp.lt.s32.totalorder %s1652_s22, %s1646_s19 }
  0x1e   : > { %1483 = vmatpush3.bf16.xpose.msra.mxu0 %v512_v4  ;;  %v521_v10 = vsel %vm450_vm0, %v1591_v8, 0  ;;  %v524_v11 = vsel %vm450_vm0, %v1592_v9, 0  ;;  %v527_v13 = vsel %vm450_vm0, %v1593_v12, 0  ;;  %v1594_v14 = vld [vmem:[%s251_s17 + $0x30] sm:$0xff]   ;;  %v1595_v16 = vld [vmem:[%s251_s17 + $0x38] sm:$0xff]   ;;  %v823_v2 = vld [vmem:[%s2198_s3 + $0x28] sm:$0xff]  ;;  %s2153_s17 = scalar_lea.hbm %s2201_s6, %s1795_s10 }
  0x1f   : > { %1539 = vmatprep.subr.msk.bf16.mxu0 %vm450_vm0, %v1589_v3  ;;  %v530_v15 = vsel %vm450_vm0, %v1594_v14, 0  ;;  %v533_v17 = vsel %vm450_vm0, %v1595_v16, 0  ;;  %v1203_v3 = vld [vmem:[%s2199_s4 + $0x8] sm:$0xff]  ;;  %p1648_p12 = pnand %p1647_p11, %p1785_p5  ;;  %p1655_p2 = por %p1654_p1, %p1653_p0 }
  0x20   : > { %860 = vperm.xlu0 %1586, %v822_v50   ;;  %890 = vperm.xlu1 %1587, %v828_v55  }
  0x21   : > { %p1649_p13 = pneg %p1648_p12 }
  0x23   : > { %p1656_p3 = pnand %p1655_p2, %p1649_p13 }
  0x24   : > { %895 = vperm.xlu0 %1586, %v829_v54   ;;  %900 = vperm.xlu1 %1587, %v830_v59  }
  0x26   : > { %1485 = vmatpush3.bf16.xpose.msra.mxu0 %v515_v5 }
  0x27   : > { %1540 = vmatprep.subr.msk.bf16.mxu0 %vm450_vm0, %v1590_v6  ;;  %v1204_v6 = vld [vmem:[%s2199_s4 + $0x10] sm:$0xff] }
  0x28   : > { %905 = vperm.xlu0 %1586, %v831_v58   ;;  %910 = vperm.xlu1 %1587, %v832_v63   ;;  %v1207_v58 = vld [vmem:[%s2199_s4 + $0x28] sm:$0xff]  ;;  %v1208_v63 = vld [vmem:[%s2199_s4 + $0x30] sm:$0xff] }
  0x2c   : > { %1214 = vperm.xlu0 %1586, %v1202_v62   ;;  %1219 = vperm.xlu1 %1587, %v1203_v3   ;;  %v837_v3 = vld [vmem:[%s2198_s3 + $0x98] sm:$0xff] }
  0x2e   : > { %1487 = vmatpush3.bf16.xpose.msra.mxu0 %v518_v7  ;;  %v833_v7 = vld [vmem:[%s2198_s3 + $0x78] sm:$0xff] }
  0x2f   : > { %1541 = vmatprep.subr.msk.bf16.mxu0 %vm450_vm0, %v1591_v8 }
  0x30   : > { %865 = vperm.xlu0 %1586, %v823_v2   ;;  %915 = vperm.xlu1 %1587, %v833_v7  }
  0x34   : > { %1224 = vperm.xlu0 %1586, %v1204_v6  }
  0x36   : > { %1489 = vmatpush3.bf16.xpose.msra.mxu0 %v521_v10  ;;  %v834_v10 = vld [vmem:[%s2198_s3 + $0x80] sm:$0xff] }
  0x37   : > { %1542 = vmatprep.subr.msk.bf16.mxu0 %vm450_vm0, %v1592_v9 }
  0x38   : > { %920 = vperm.xlu0 %1586, %v834_v10  }
  0x3e   : > { %1491 = vmatpush3.bf16.xpose.msra.mxu0 %v524_v11  ;;  %v824_v11 = vld [vmem:[%s2198_s3 + $0x30] sm:$0xff] }
  0x3f   : > { %1543 = vmatprep.subr.msk.bf16.mxu0 %vm450_vm0, %v1593_v12  ;;  %870 = vperm.xlu1 %1587, %v824_v11   ;;  %v825_v12 = vld [vmem:[%s2198_s3 + $0x38] sm:$0xff] }
  0x40   : > { %875 = vperm.xlu0 %1586, %v825_v12  }
  0x46   : > { %1493 = vmatpush3.bf16.xpose.msra.mxu0 %v527_v13  ;;  %v1205_v13 = vld [vmem:[%s2199_s4 + $0x18] sm:$0xff] }
  0x47   : > { %1544 = vmatprep.subr.msk.bf16.mxu0 %vm450_vm0, %v1594_v14  ;;  %1229 = vperm.xlu1 %1587, %v1205_v13  }
  0x4e   : > { %1495 = vmatpush3.bf16.xpose.msra.mxu0 %v530_v15 }
  0x4f   : > { %1545 = vmatprep.subr.msk.bf16.mxu0 %vm450_vm0, %v1595_v16 }
  0x56   : > { %1497 = vmatpush3.bf16.xpose.msra.mxu0 %v533_v17 }
  0x5d   : > { %1499 = vmatmul.mubr.msk.bf16.vlgmr.msra.gmra.mrb[0].mxu0 %vm450_vm0, %v1597_v18 }
  0x5e   : > { %1502 = vmatprep.mubr.msk.bf16.mxu0 %vm450_vm0, %v1598_v19 }
  0x65   : > { %1503 = vmatmul.mubr.msk.bf16.gmra.mrb[4].mxu0 %vm450_vm0, %v1599_v20 }
  0x66   : > { %1506 = vmatprep.mubr.msk.bf16.mxu0 %vm450_vm0, %v1600_v21 }
  0x6d   : > { %1507 = vmatmul.mubr.msk.bf16.gmra.mrb[8].mxu0 %vm450_vm0, %v1601_v22 }
  0x6e   : > { %1510 = vmatprep.mubr.msk.bf16.mxu0 %vm450_vm0, %v1602_v23 }
  0x75   : > { %1511 = vmatmul.mubr.msk.bf16.gmra.mrb[12].mxu0 %vm450_vm0, %v1603_v24 }
  0x76   : > { %1514 = vmatprep.mubr.msk.bf16.mxu0 %vm450_vm0, %v1604_v25  ;;  %v1206_v25 = vld [vmem:[%s2199_s4 + $0x20] sm:$0xff] }
  0x77   : > { %1234 = vperm.xlu0 %1586, %v1206_v25  }
  0x7d   : > { %1515 = vmatmul.mubr.msk.bf16.gmra.mrb[16].mxu0 %vm450_vm0, %v1605_v26  ;;  %v835_v26 = vld [vmem:[%s2198_s3 + $0x88] sm:$0xff] }
  0x7e   : > { %1518 = vmatprep.mubr.msk.bf16.mxu0 %vm450_vm0, %v1606_v27  ;;  %925 = vperm.xlu1 %1587, %v835_v26  }
  0x85   : > { %1519 = vmatmul.mubr.msk.bf16.gmra.mrb[20].mxu0 %vm450_vm0, %v1607_v28 }
  0x86   : > { %1522 = vmatprep.mubr.msk.bf16.mxu0 %vm450_vm0, %v1608_v29 }
  0x8d   : > { %1523 = vmatmul.mubr.msk.bf16.gmra.mrb[24].mxu0 %vm450_vm0, %v1609_v30 }
  0x8e   : > { %1526 = vmatprep.mubr.msk.bf16.mxu0 %vm450_vm0, %v1610_v31 }
  0x95   : > { %1527 = vmatmul.mubr.msk.bf16.gmra.mrb[28].mxu0 %vm450_vm0, %v1611_v32 }
  0x96   : > { %1530 = vmatprep.mubr.msk.bf16.mxu0 %vm450_vm0, %v1612_v33  ;;  %v836_v33 = vld [vmem:[%s2198_s3 + $0x90] sm:$0xff] }
  0x97   : > { %930 = vperm.xlu0 %1586, %v836_v33  }
  0x9d   : > { %1531 = vmatmul.mubr.msk.bf16.gmra.mrb[32].mxu0 %vm450_vm0, %v1613_v34 }
  0x9e   : > { %1534 = vmatprep.mubr.msk.bf16.mxu0 %vm450_vm0, %v1614_v35 }
  0xa5   : > { %1535 = vmatmul.mubr.msk.bf16.gmra.mrb[36].mxu0 %vm450_vm0, %v1615_v36  ;;  %v826_v36 = vld [vmem:[%s2198_s3 + $0x40] sm:$0xff] }
  0xa6   : > { %880 = vperm.xlu1 %1587, %v826_v36  }
  0xaa   : > { %1239 = vperm.xlu1 %1587, %v1207_v58  }
  0xae   : > { %935 = vperm.xlu1 %1587, %v837_v3   ;;  %v1627_v3 = vld [vmem:[%s2197_s2 + $0x30] ss:$8 sps:$4 sm:$0xff]  }
 0x130   : > { %v1905_v39 = vpop.f32.mrb[0].mxu0 }
 0x131   : > { %v1907_v40 = vpop.f32.mrb[1].mxu0  ;;  %v730_v15 = vmax.f32 %v1905_v39, 0.0 }
 0x132   : > { %v1912_v42 = vpop.f32.mrb[2].mxu0  ;;  %v728_v18 = vmax.f32 %v1907_v40, 0.0 }
 0x133   : > { %v1914_v43 = vpop.f32.mrb[3].mxu0  ;;  %v731_v21 = vmax.f32 %v1912_v42, 0.0 }
 0x134   : > { %v729_v27 = vmax.f32 %v1914_v43, 0.0 }
 0x138   : > { %v1916_v44 = vpop.f32.mrb[4].mxu0 }
 0x139   : > { %v1918_v45 = vpop.f32.mrb[5].mxu0  ;;  %v734_v38 = vmax.f32 %v1916_v44, 0.0  ;;  %v827_v44 = vld [vmem:[%s2198_s3 + $0x48] sm:$0xff] }
 0x13a   : > { %v1926_v48 = vpop.f32.mrb[6].mxu0  ;;  %v732_v41 = vmax.f32 %v1918_v45, 0.0  ;;  %885 = vperm.xlu0 %1586, %v827_v44  }
 0x13b   : > { %v1928_v49 = vpop.f32.mrb[7].mxu0  ;;  %v735_v46 = vmax.f32 %v1926_v48, 0.0 }
 0x13c   : > { %v733_v54 = vmax.f32 %v1928_v49, 0.0 }
 0x13e   : > { %1244 = vperm.xlu0 %1586, %v1208_v63   ;;  %v1621_v63 = vld [vmem:[%s2197_s2 + $0x10] ss:$8 sps:$4 sm:$0xff]  }
 0x140   : > { %v1936_v52 = vpop.f32.mrb[8].mxu0 }
 0x141   : > { %v1938_v53 = vpop.f32.mrb[9].mxu0  ;;  %v738_v6 = vmax.f32 %v1936_v52, 0.0  ;;  %v1210_v52 = vld [vmem:[%s2199_s4 + $0x40] sm:$0xff] }
 0x142   : > { %v1946_v56 = vpop.f32.mrb[10].mxu0  ;;  %v736_v11 = vmax.f32 %v1938_v53, 0.0  ;;  %1254 = vperm.xlu0 %1586, %v1210_v52   ;;  %v1643_v52 = vld [vmem:[%s2197_s2 + $0x94] ss:$8 sps:$4 sm:$0xff]  }
 0x143   : > { %v1948_v57 = vpop.f32.mrb[11].mxu0 }
 0x148   : > { %v1956_v60 = vpop.f32.mrb[12].mxu0 }
 0x149   : > { %v1958_v61 = vpop.f32.mrb[13].mxu0  ;;  %v742_v26 = vmax.f32 %v1956_v60, 0.0 }
 0x14a   : > { %v1966_v0 = vpop.f32.mrb[14].mxu0 }
 0x14b   : > { %v1968_v1 = vpop.f32.mrb[15].mxu0 }
 0x14c   : > { %v741_v36 = vmax.f32 %v1968_v1, 0.0 }
 0x150   : > { %v1976_v4 = vpop.f32.mrb[16].mxu0 }
 0x151   : > { %v1978_v5 = vpop.f32.mrb[17].mxu0 }
 0x152   : > { %v1986_v8 = vpop.f32.mrb[18].mxu0 }
 0x153   : > { %v1988_v9 = vpop.f32.mrb[19].mxu0  ;;  %v747_v1 = vmax.f32 %v1986_v8, 0.0  ;;  %v1616_v8 = vld [vmem:[%s2197_s2] ss:$8 sps:$4 sm:$0xff]  }
 0x158   : > { %v1520_v14 = vpop.f32.mrb[20].mxu0 }
 0x159   : > { %v750_v16 = vmax.f32 %v1520_v14, 0.0  ;;  %v649_v17 = vpop.f32.mrb[21].mxu0  ;;  %v739_v14 = vmax.f32 %v1946_v56, 0.0 }
 0x15a   : > { %v748_v19 = vmax.f32 %v649_v17, 0.0  ;;  %v1521_v20 = vpop.f32.mrb[22].mxu0 }
 0x15b   : > { %v770_v22 = vmax.f32 %v730_v15, %v750_v16  ;;  %v751_v23 = vmax.f32 %v1521_v20, 0.0  ;;  %v652_v24 = vpop.f32.mrb[23].mxu0  ;;  %v1209_v20 = vld [vmem:[%s2199_s4 + $0x38] sm:$0xff] }
 0x15c   : > { %v768_v28 = vmax.f32 %v728_v18, %v748_v19  ;;  %v749_v29 = vmax.f32 %v652_v24, 0.0  ;;  %v737_v18 = vmax.f32 %v1948_v57, 0.0  ;;  %1249 = vperm.xlu1 %1587, %v1209_v20   ;;  %v1211_v57 = vld [vmem:[%s2199_s4 + $0x48] sm:$0xff] }
 0x15d   : > { %v771_v30 = vmax.f32 %v731_v21, %v751_v23  ;;  %v1287_v23 = vld [vmem:[#allocation2] sm:$0x1] }
 0x15e   : > { %v769_v31 = vmax.f32 %v729_v27, %v749_v29  ;;  %v740_v29 = vmax.f32 %v1958_v61, 0.0  ;;  %1290 = vperm.xlu0 %1586, %v1287_v23  }
 0x15f   : > { %v809_v32 = vpack.c.bf16 %v771_v30, %v770_v22 }
 0x160   : > { %v1524_v34 = vpop.f32.mrb[24].mxu0  ;;  %v808_v35 = vpack.c.bf16 %v769_v31, %v768_v28  ;;  %1259 = vperm.xlu1 %1587, %v1211_v57  }
 0x161   : > { %v754_v39 = vmax.f32 %v1524_v34, 0.0  ;;  %v665_v40 = vpop.f32.mrb[25].mxu0 }
 0x162   : > { %v752_v42 = vmax.f32 %v665_v40, 0.0  ;;  %v1525_v43 = vpop.f32.mrb[26].mxu0  ;;  %1060 = vmatpush1.bf16.msra.mxu1 %v808_v35 }
 0x163   : > { %v774_v47 = vmax.f32 %v734_v38, %v754_v39  ;;  %v755_v50 = vmax.f32 %v1525_v43, 0.0  ;;  %v668_v51 = vpop.f32.mrb[27].mxu0  ;;  %1061 = vmatprep.subr.bf16.mxu1 %v1710_v37 }
 0x164   : > { %v772_v55 = vmax.f32 %v732_v41, %v752_v42  ;;  %v753_v45 = vmax.f32 %v668_v51, 0.0 }
 0x165   : > { %v775_v59 = vmax.f32 %v735_v46, %v755_v50 }
 0x166   : > { %v773_v48 = vmax.f32 %v733_v54, %v753_v45  ;;  %1062 = vmatpush1.bf16.msra.mxu1 %v809_v32  ;;  %v743_v32 = vmax.f32 %v1966_v0, 0.0  ;;  %v746_v0 = vmax.f32 %v1976_v4, 0.0  ;;  %v745_v45 = vmax.f32 %v1988_v9, 0.0  ;;  %v1619_v9 = vld [vmem:[%s2197_s2 + $0x14] ss:$8 sps:$4 sm:$0xff]  }
 0x167   : > { %1063 = vmatprep.subr.bf16.mxu1 %v1710_v37  ;;  %v811_v62 = vpack.c.bf16 %v775_v59, %v774_v47  ;;  %v744_v47 = vmax.f32 %v1978_v5, 0.0 }
 0x168   : > { %v1528_v2 = vpop.f32.mrb[28].mxu0  ;;  %v810_v49 = vpack.c.bf16 %v773_v48, %v772_v55 }
 0x169   : > { %v758_v7 = vmax.f32 %v1528_v2, 0.0  ;;  %v681_v10 = vpop.f32.mrb[29].mxu0  ;;  %v1624_v2 = vld [vmem:[%s2197_s2 + $0x20] ss:$8 sps:$4 sm:$0xff]  }
 0x16a   : > { %v756_v12 = vmax.f32 %v681_v10, 0.0  ;;  %v1529_v13 = vpop.f32.mrb[30].mxu0  ;;  %1064 = vmatpush1.bf16.msra.mxu1 %v810_v49  ;;  %v1625_v49 = vld [vmem:[%s2197_s2 + $0x34] ss:$8 sps:$4 sm:$0xff]  }
 0x16b   : > { %v778_v15 = vmax.f32 %v738_v6, %v758_v7  ;;  %v759_v16 = vmax.f32 %v1529_v13, 0.0  ;;  %v684_v17 = vpop.f32.mrb[31].mxu0  ;;  %1065 = vmatprep.subr.bf16.mxu1 %v1710_v37  ;;  %v1628_v6 = vld [vmem:[%s2197_s2 + $0x44] ss:$8 sps:$4 sm:$0xff]   ;;  %v1630_v7 = vld [vmem:[%s2197_s2 + $0x40] ss:$8 sps:$4 sm:$0xff]  }
 0x16c   : > { %v776_v19 = vmax.f32 %v736_v11, %v756_v12  ;;  %v757_v53 = vmax.f32 %v684_v17, 0.0  ;;  %v1631_v10 = vld [vmem:[%s2197_s2 + $0x54] ss:$8 sps:$4 sm:$0xff]   ;;  %v1633_v11 = vld [vmem:[%s2197_s2 + $0x50] ss:$8 sps:$4 sm:$0xff]  }
 0x16d   : > { %v779_v21 = vmax.f32 %v739_v14, %v759_v16  ;;  %v1634_v12 = vld [vmem:[%s2197_s2 + $0x64] ss:$8 sps:$4 sm:$0xff]   ;;  %v1636_v13 = vld [vmem:[%s2197_s2 + $0x60] ss:$8 sps:$4 sm:$0xff]   ;;  %v1637_v14 = vld [vmem:[%s2197_s2 + $0x74] ss:$8 sps:$4 sm:$0xff]  }
 0x16e   : > { %v777_v56 = vmax.f32 %v737_v18, %v757_v53  ;;  %1066 = vmatpush1.bf16.msra.mxu1 %v811_v62  ;;  %v1640_v16 = vld [vmem:[%s2197_s2 + $0x84] ss:$8 sps:$4 sm:$0xff]   ;;  %v1642_v17 = vld [vmem:[%s2197_s2 + $0x80] ss:$8 sps:$4 sm:$0xff]   ;;  %v1645_v18 = vld [vmem:[%s2197_s2 + $0x90] ss:$8 sps:$4 sm:$0xff]   ;;  %v851_v53 = vpop.permute.xlu1 %850 }
 0x16f   : > { %1067 = vmatprep.subr.bf16.mxu1 %v1710_v37  ;;  %v813_v22 = vpack.c.bf16 %v779_v21, %v778_v15  ;;  %v1639_v15 = vld [vmem:[%s2197_s2 + $0x70] ss:$8 sps:$4 sm:$0xff]  }
 0x170   : > { %v1532_v24 = vpop.f32.mrb[32].mxu0  ;;  %v812_v25 = vpack.c.bf16 %v777_v56, %v776_v19  ;;  %v841_v19 = vpop.permute.xlu0 %840 }
 0x171   : > { %v762_v27 = vmax.f32 %v1532_v24, 0.0  ;;  %v697_v28 = vpop.f32.mrb[33].mxu0 }
 0x172   : > { %v760_v30 = vmax.f32 %v697_v28, 0.0  ;;  %v1533_v31 = vpop.f32.mrb[34].mxu0  ;;  %1068 = vmatpush1.bf16.msra.mxu1 %v812_v25  ;;  %v856_v21 = vpop.permute.xlu1 %855 }
 0x173   : > { %v782_v33 = vmax.f32 %v742_v26, %v762_v27  ;;  %v763_v34 = vmax.f32 %v1533_v31, 0.0  ;;  %v700_v35 = vpop.f32.mrb[35].mxu0  ;;  %1069 = vmatprep.subr.bf16.mxu1 %v1710_v37 }
 0x174   : > { %v780_v38 = vmax.f32 %v740_v29, %v760_v30  ;;  %v761_v60 = vmax.f32 %v700_v35, 0.0  ;;  %v846_v20 = vpop.permute.xlu0 %845 }
 0x175   : > { %v783_v39 = vmax.f32 %v743_v32, %v763_v34 }
 0x176   : > { %v781_v40 = vmax.f32 %v741_v36, %v761_v60  ;;  %1070 = vmatpush1.bf16.msra.mxu1 %v813_v22  ;;  %v891_v57 = vpop.permute.xlu1 %890 }
 0x177   : > { %1071 = vmatprep.subr.bf16.mxu1 %v1710_v37  ;;  %v815_v61 = vpack.c.bf16 %v783_v39, %v782_v33 }
 0x178   : > { %v1536_v41 = vpop.f32.mrb[36].mxu0  ;;  %v814_v42 = vpack.c.bf16 %v781_v40, %v780_v38  ;;  %v2130_v25 = vpop.permute.xlu0 %860 }
 0x179   : > { %v766_v43 = vmax.f32 %v1536_v41, 0.0  ;;  %v713_v46 = vpop.f32.mrb[37].mxu0 }
 0x17a   : > { %v764_v50 = vmax.f32 %v713_v46, 0.0  ;;  %v1537_v51 = vpop.f32.mrb[38].mxu0  ;;  %1072 = vmatpush1.bf16.msra.mxu1 %v814_v42  ;;  %v901_v31 = vpop.permute.xlu1 %900 }
 0x17b   : > { %v786_v44 = vmax.f32 %v746_v0, %v766_v43  ;;  %v767_v54 = vmax.f32 %v1537_v51, 0.0  ;;  %v716_v55 = vpop.f32.mrb[39].mxu0  ;;  %1073 = vmatprep.subr.bf16.mxu1 %v1710_v37 }
 0x17c   : > { %v784_v58 = vmax.f32 %v744_v47, %v764_v50  ;;  %v765_v59 = vmax.f32 %v716_v55, 0.0  ;;  %v896_v28 = vpop.permute.xlu0 %895 }
 0x17d   : > { %v787_v48 = vmax.f32 %v747_v1, %v767_v54 }
 0x17e   : > { %v785_v4 = vmax.f32 %v745_v45, %v765_v59  ;;  %1074 = vmatpush1.bf16.msra.mxu1 %v815_v61  ;;  %v911_v35 = vpop.permute.xlu1 %910 }
 0x17f   : > { %1075 = vmatprep.subr.bf16.mxu1 %v1710_v37  ;;  %v817_v5 = vpack.c.bf16 %v787_v48, %v786_v44 }
 0x180   : > { %v816_v62 = vpack.c.bf16 %v785_v4, %v784_v58  ;;  %v906_v32 = vpop.permute.xlu0 %905 }
 0x182   : > { %1076 = vmatpush1.bf16.msra.mxu1 %v816_v62  ;;  %v1220_v39 = vpop.permute.xlu1 %1219 }
 0x183   : > { %1077 = vmatprep.subr.bf16.mxu1 %v1710_v37  ;;  %v1622_v37 = vld [vmem:[%s2197_s2 + $0x24] ss:$8 sps:$4 sm:$0xff]  }
 0x184   : > { %v1215_v60 = vpop.permute.xlu0 %1214 }
 0x186   : > { %1078 = vmatpush1.bf16.msra.mxu1 %v817_v5  ;;  %v916_v43 = vpop.permute.xlu1 %915 }
 0x188   : > { %v866_v0 = vpop.permute.xlu0 %865 }
 0x189   : > { %1092 = vmatmul.mubr.bf16.vlgmr.msra.gmra.mrb[0].mxu1 %v1616_v8 }
 0x18a   : > { %1442 = vmatprep.mubr.msk.bf16.mxu1 %vm1028_vm1, %v1619_v9  ;;  %v871_v44 = vpop.permute.xlu1 %870 }
 0x18c   : > { %v1225_v50 = vpop.permute.xlu0 %1224 }
 0x18e   : > { %v1230_v4 = vpop.permute.xlu1 %1229 }
 0x190   : > { %v2140_v55 = vpop.permute.xlu0 %920 }
 0x191   : > { %1100 = vmatmul.mubr.bf16.gmra.mrb[4].mxu1 %v1621_v63 }
 0x192   : > { %1443 = vmatprep.mubr.msk.bf16.mxu1 %vm1028_vm1, %v1622_v37 }
 0x199   : > { %1108 = vmatmul.mubr.bf16.gmra.mrb[8].mxu1 %v1624_v2 }
 0x19a   : > { %1444 = vmatprep.mubr.msk.bf16.mxu1 %vm1028_vm1, %v1625_v49 }
 0x1a1   : > { %1116 = vmatmul.mubr.bf16.gmra.mrb[12].mxu1 %v1627_v3  ;;  %v876_v3 = vpop.permute.xlu0 %875 }
 0x1a2   : > { %1445 = vmatprep.mubr.msk.bf16.mxu1 %vm1028_vm1, %v1628_v6 }
 0x1a9   : > { %1124 = vmatmul.mubr.bf16.gmra.mrb[16].mxu1 %v1630_v7 }
 0x1aa   : > { %1446 = vmatprep.mubr.msk.bf16.mxu1 %vm1028_vm1, %v1631_v10  ;;  %v926_v10 = vpop.permute.xlu1 %925 }
 0x1b1   : > { %1132 = vmatmul.mubr.bf16.gmra.mrb[20].mxu1 %v1633_v11 }
 0x1b2   : > { %1447 = vmatprep.mubr.msk.bf16.mxu1 %vm1028_vm1, %v1634_v12 }
 0x1b9   : > { %1140 = vmatmul.mubr.bf16.gmra.mrb[24].mxu1 %v1636_v13 }
 0x1ba   : > { %1448 = vmatprep.mubr.msk.bf16.mxu1 %vm1028_vm1, %v1637_v14 }
 0x1c1   : > { %1148 = vmatmul.mubr.bf16.gmra.mrb[28].mxu1 %v1639_v15 }
 0x1c2   : > { %1449 = vmatprep.mubr.msk.bf16.mxu1 %vm1028_vm1, %v1640_v16 }
 0x1c9   : > { %1156 = vmatmul.mubr.bf16.gmra.mrb[32].mxu1 %v1642_v17 }
 0x1ca   : > { %1450 = vmatprep.mubr.msk.bf16.mxu1 %vm1028_vm1, %v1643_v52 }
 0x1d1   : > { %1164 = vmatmul.mubr.bf16.gmra.mrb[36].mxu1 %v1645_v18 }
 0x25c   : > { %v1093_v56 = vpop.f32.mrb[0].mxu1 }
 0x25d   : > { %v1095_v22 = vpop.f32.mrb[1].mxu1  ;;  %v1094_v54 = vadd.f32 %v1093_v56, %v841_v19 }
 0x25e   : > { %v1096_v23 = vpop.f32.mrb[2].mxu1  ;;  %v1235_v22 = vpop.permute.xlu0 %1234 }
 0x25f   : > { %v1098_v24 = vpop.f32.mrb[3].mxu1  ;;  %v1097_v58 = vadd.f32 %v1096_v23, %v846_v20  ;;  %v1172_v62 = vmax.f32 %v1094_v54, 0.0 }
 0x261   : > { %v1173_v37 = vmax.f32 %v1097_v58, 0.0 }
 0x264   : > { %v1101_v26 = vpop.f32.mrb[4].mxu1 }
 0x265   : > { %v1103_v27 = vpop.f32.mrb[5].mxu1  ;;  %v1102_v6 = vadd.f32 %v1101_v26, %v851_v53 }
 0x266   : > { %v1104_v29 = vpop.f32.mrb[6].mxu1  ;;  %v881_v27 = vpop.permute.xlu1 %880 }
 0x267   : > { %v1106_v30 = vpop.f32.mrb[7].mxu1  ;;  %v1105_v12 = vadd.f32 %v1104_v29, %v856_v21  ;;  %v1174_v52 = vmax.f32 %v1102_v6, 0.0 }
 0x269   : > { %v1175_v23 = vmax.f32 %v1105_v12, 0.0 }
 0x26a   : > { %v1240_v54 = vpop.permute.xlu1 %1239 }
 0x26c   : > { %v1109_v33 = vpop.f32.mrb[8].mxu1 }
 0x26d   : > { %v1111_v34 = vpop.f32.mrb[9].mxu1  ;;  %v1110_v53 = vadd.f32 %v1109_v33, %v2130_v25 }
 0x26e   : > { %v1112_v36 = vpop.f32.mrb[10].mxu1 }
 0x26f   : > { %v1114_v38 = vpop.f32.mrb[11].mxu1  ;;  %v1113_v29 = vadd.f32 %v1112_v36, %v866_v0 }
 0x274   : > { %v2132_v40 = vpop.f32.mrb[12].mxu1 }
 0x275   : > { %v1119_v61 = vpop.f32.mrb[13].mxu1  ;;  %v1118_v25 = vadd.f32 %v2132_v40, %v871_v44 }
 0x276   : > { %v2134_v41 = vpop.f32.mrb[14].mxu1  ;;  %v1176_v61 = vmax.f32 %v1110_v53, 0.0 }
 0x277   : > { %v1122_v42 = vpop.f32.mrb[15].mxu1 }
 0x27c   : > { %v2136_v46 = vpop.f32.mrb[16].mxu1 }
 0x27d   : > { %v1127_v47 = vpop.f32.mrb[17].mxu1 }
 0x27e   : > { %v2138_v51 = vpop.f32.mrb[18].mxu1 }
 0x27f   : > { %v1130_v1 = vpop.f32.mrb[19].mxu1 }
 0x284   : > { %v1133_v45 = vpop.f32.mrb[20].mxu1 }
 0x285   : > { %v1134_v59 = vadd.f32 %v1133_v45, %v891_v57  ;;  %v1135_v48 = vpop.f32.mrb[21].mxu1  ;;  %v1177_v45 = vmax.f32 %v1113_v29, 0.0 }
 0x286   : > { %v1136_v5 = vpop.f32.mrb[22].mxu1 }
 0x287   : > { %v1182_v8 = vmax.f32 %v1134_v59, 0.0  ;;  %v1137_v9 = vadd.f32 %v1136_v5, %v896_v28  ;;  %v1138_v63 = vpop.f32.mrb[23].mxu1 }
 0x289   : > { %v1192_v2 = vmax.f32 %v1172_v62, %v1182_v8  ;;  %v1183_v49 = vmax.f32 %v1137_v9, 0.0  ;;  %v936_v8 = vpop.permute.xlu1 %935  ;;  %v1178_v9 = vmax.f32 %v1118_v25, 0.0 }
 0x28b   : > { %v1193_v7 = vmax.f32 %v1173_v37, %v1183_v49  ;;  %v1262_v13 = vmul.f32 %v1215_v60, %v1192_v2  ;;  %v931_v60 = vpop.permute.xlu0 %930 }
 0x28c   : > { %v1141_v11 = vpop.f32.mrb[24].mxu1 }
 0x28d   : > { %v1263_v14 = vmul.f32 %v1220_v39, %v1193_v7  ;;  %v1142_v15 = vadd.f32 %v1141_v11, %v901_v31  ;;  %v1143_v16 = vpop.f32.mrb[25].mxu1  ;;  %v1126_v11 = vadd.f32 %v2136_v46, %v881_v27 }
 0x28e   : > { %v1144_v17 = vpop.f32.mrb[26].mxu1 }
 0x28f   : > { %v1272_v18 = vadd.f32 %v1263_v14, %v1262_v13  ;;  %v1184_v19 = vmax.f32 %v1142_v15, 0.0  ;;  %v1145_v20 = vadd.f32 %v1144_v17, %v906_v32  ;;  %v1146_v56 = vpop.f32.mrb[27].mxu1  ;;  %v886_v36 = vpop.permute.xlu0 %885 }
 0x291   : > { %v1194_v24 = vmax.f32 %v1174_v52, %v1184_v19  ;;  %v1185_v57 = vmax.f32 %v1145_v20, 0.0 }
 0x293   : > { %v1264_v26 = vmul.f32 %v1225_v50, %v1194_v24  ;;  %v1195_v28 = vmax.f32 %v1175_v23, %v1185_v57  ;;  %v1245_v7 = vpop.permute.xlu0 %1244 }
 0x294   : > { %v1149_v21 = vpop.f32.mrb[28].mxu1 }
 0x295   : > { %v1273_v30 = vadd.f32 %v1272_v18, %v1264_v26  ;;  %v1265_v31 = vmul.f32 %v1230_v4, %v1195_v28  ;;  %v1150_v34 = vadd.f32 %v1149_v21, %v911_v35  ;;  %v1151_v38 = vpop.f32.mrb[29].mxu1  ;;  %v1121_v35 = vadd.f32 %v2134_v41, %v876_v3  ;;  %v1250_v3 = vpop.permute.xlu1 %1249 }
 0x296   : > { %v1152_v39 = vpop.f32.mrb[30].mxu1  ;;  %v1180_v18 = vmax.f32 %v1126_v11, 0.0  ;;  %v1293_v28 = vlaneseq }
 0x297   : > { %v1274_v32 = vadd.f32 %v1273_v30, %v1265_v31  ;;  %v1186_v42 = vmax.f32 %v1150_v34, 0.0  ;;  %v1153_v47 = vadd.f32 %v1152_v39, %v916_v43  ;;  %v1154_v1 = vpop.f32.mrb[31].mxu1  ;;  %v1179_v6 = vmax.f32 %v1121_v35, 0.0  ;;  %v1255_v24 = vpop.permute.xlu0 %1254 }
 0x298   : > { %v1294_v30 = vshrl.u32 %v1293_v28, 7 }
 0x299   : > { %v1196_v58 = vmax.f32 %v1176_v61, %v1186_v42  ;;  %v1187_v59 = vmax.f32 %v1153_v47, 0.0  ;;  %v1260_v53 = vpop.permute.xlu1 %1259 }
 0x29a   : > { %v1295_v38 = vsub.s32 0, %v1294_v30 }
 0x29b   : > { %v1266_v33 = vmul.f32 %v1235_v22, %v1196_v58  ;;  %v1197_v50 = vmax.f32 %v1177_v45, %v1187_v59  ;;  %v1291_v39 = vpop.permute.xlu0 %1290 }
 0x29c   : > { %v1157_v0 = vpop.f32.mrb[32].mxu1 }
 0x29d   : > { %v1275_v48 = vadd.f32 %v1274_v32, %v1266_v33  ;;  %v1267_v4 = vmul.f32 %v1240_v54, %v1197_v50  ;;  %v1158_v5 = vadd.f32 %v1157_v0, %v2140_v55  ;;  %v1159_v62 = vpop.f32.mrb[33].mxu1  ;;  %v1129_v55 = vadd.f32 %v2138_v51, %v886_v36 }
 0x29e   : > { %v1160_v43 = vpop.f32.mrb[34].mxu1  ;;  %v1296_v32 = vrot.slane %v1291_v39, %v1295_v38 }
 0x29f   : > { %v1276_v63 = vadd.f32 %v1275_v48, %v1267_v4  ;;  %v1188_v37 = vmax.f32 %v1158_v5, 0.0  ;;  %v1161_v2 = vadd.f32 %v1160_v43, %v926_v10  ;;  %v1162_v49 = vpop.f32.mrb[35].mxu1  ;;  %v1181_v22 = vmax.f32 %v1129_v55, 0.0 }
 0x2a1   : > { %v1198_v40 = vmax.f32 %v1178_v9, %v1188_v37  ;;  %v1189_v44 = vmax.f32 %v1161_v2, 0.0 }
 0x2a3   : > { %v1268_v12 = vmul.f32 %v1245_v7, %v1198_v40  ;;  %v1199_v41 = vmax.f32 %v1179_v6, %v1189_v44 }
 0x2a4   : > { %v1165_v13 = vpop.f32.mrb[36].mxu1 }
 0x2a5   : > { %v1277_v14 = vadd.f32 %v1276_v63, %v1268_v12  ;;  %v1269_v15 = vmul.f32 %v1250_v3, %v1199_v41  ;;  %v1166_v16 = vadd.f32 %v1165_v13, %v931_v60  ;;  %v1167_v17 = vpop.f32.mrb[37].mxu1 }
 0x2a6   : > { %v1168_v52 = vpop.f32.mrb[38].mxu1 }
 0x2a7   : > { %v1278_v10 = vadd.f32 %v1277_v14, %v1269_v15  ;;  %v1190_v19 = vmax.f32 %v1166_v16, 0.0  ;;  %v1169_v20 = vadd.f32 %v1168_v52, %v936_v8  ;;  %v1170_v56 = vpop.f32.mrb[39].mxu1 }
 0x2a9   : > { %v1200_v23 = vmax.f32 %v1180_v18, %v1190_v19  ;;  %v1191_v46 = vmax.f32 %v1169_v20, 0.0 }
 0x2ab   : > { %v1270_v57 = vmul.f32 %v1255_v24, %v1200_v23  ;;  %v1201_v27 = vmax.f32 %v1181_v22, %v1191_v46 }
 0x2ad   : > { %v1279_v26 = vadd.f32 %v1278_v10, %v1270_v57  ;;  %v1271_v51 = vmul.f32 %v1260_v53, %v1201_v27 }
 0x2af   : > { %v1280_v21 = vadd.f32 %v1279_v26, %v1271_v51 }
 0x2b1   : > { %v1281_v29 = vrot.slane %v1280_v21, 4 }
 0x2b3   : > { %v1282_v31 = vadd.f32 %v1281_v29, %v1280_v21 }
 0x2b5   : > { %v1283_v34 = vrot.slane %v1282_v31, 2 }
 0x2b7   : > { %v1284_v60 = vadd.f32 %v1283_v34, %v1282_v31 }
 0x2b9   : > { %v1285_v61 = vrot.slane %v1284_v60, 1 }
 0x2bb   : > { %v1286_v42 = vadd.f32 %v1285_v61, %v1284_v60 }
 0x2bd   : > { %v1297_v47 = vadd.f32 %v1296_v32, %v1286_v42 }
 0x2bf   : > { %1298 = vst [vmem:[%s246_s13] sm:$0x1] %v1297_v47 }
 0x2c0   : > { %1659 = shalt.err (!%p1656_p3)
}
 0x2c1   : > { %s1660_s10 = scalar_lea.hbm %s2153_s17, 16  ;;  %s1664_s29 = scalar_lea.hbm %s2201_s6, 32 }
 0x2c2   : > { %p1661_p4 = scmp.ne.s32.totalorder %s2153_s17, %s1660_s10  ;;  %p1665_p9 = scmp.lt.u32.totalorder %s2153_s17, %s2201_s6 }
 0x2c3   : > { %p1666_p10 = scmp.lt.u32.totalorder %s1664_s29, %s1660_s10  ;;  %p1668_p12 = scmp.lt.u32.totalorder %s1660_s10, %s2153_s17 }
 0x2c4   : > { %p1662_p7 = pnand %p1661_p4, %p1785_p5 }
 0x2c5   : > { %p1667_p11 = por %p1666_p10, %p1665_p9 }
 0x2c6   : > { %p1663_p8 = pneg %p1662_p7 }
 0x2c7   : > { %p1669_p13 = por %p1668_p12, %p1667_p11 }
 0x2c9   : > { %p1670_p0 = pnand %p1669_p13, %p1663_p8 }
 0x2cb   : > { %1673 = shalt.err (!%p1670_p0)
}
 0x2cc   : > { %1546 = dma.vmem_to_hbm [thread:$0]  (%p1785_p5), %s2155_s14, 16, %s2153_s17, %s1300_s18  }
 0x2cd PF: > { %p1552_p1 = scmp.ge.s32.totalorder %s1708_s26, 2  ;;  %s1324_s12 = sand.u32 1, %s1696_s23  }
 0x2ce   : > { %s1325_s13 = scalar_lea.sflag [#allocation4], %s1324_s12 }
 0x2cf   : > { %p1549_p2 = pnand %p1552_p1, %p1789_p6 }
 0x2d1   : > { %1691 = dma.done.wait (!%p1549_p2), %s1325_s13, 16  }
 0x2d2   : > { %1693 = vsyncadd (!%p1549_p2), %s1325_s13, 4294967280  ;;  %p18_p3 = scmp.ge.s32.totalorder %s1773_s28, 4   ;;  %s2204_s23 = smov %s1700_s24 }
 0x2d3   : > { %s2205_s24 = smov %s1704_s25  ;;  %s2206_s25 = smov %s1783_s7 }
 0x2d4   : > { %s2207_s26 = smov %s1773_s28  ;;  %20 = sbr.rel (!%p18_p3) target bundleno = 6 (0x6), region = 79 }
 0x2db   :  { %1329 = vsyncpa [#allocation4], 1 }
 0x2dc   :  { %1331 = vsyncpa [#allocation4 + $0x1], 1 }

</bundles_post_ra>
